<compile_context>
chip_gen: v6e
topology: v6e:2x2x1
jax: 0.10.0
libtpu: 0.0.40
codegen_flags: <defaults>
</compile_context>

<pallas_src>
import functools

import jax
import jax.numpy as jnp
from jax.experimental import pallas as pl
from jax.experimental.pallas import tpu as pltpu

C_PAD = 128                    # class dim padded to one full lane vreg
LANE = 128
VMEM_LIMIT = 32 * 1024 * 1024  # explicit scoped-VMEM budget (safe on v5e/v6e/v7x)


def _round_up(v, m):
    return (v + m - 1) // m * m


def _choose_tiles(n):
    """Node padding + (row, reduction) tile sizes for the propagation kernels.

    n_pad is a multiple of 128 so A_hat loads are lane-dense and bf16 sublane
    packing (16) is satisfied.  Row / reduction tiles prefer 256+ (v6e/v7x MXU
    is 2x256x256); 128 is used when the padded graph is smaller.
    """
    n_pad = _round_up(max(n, LANE), LANE)
    tm = 256 if n_pad % 256 == 0 else 128
    tk = 512 if n_pad % 512 == 0 else (256 if n_pad % 256 == 0 else 128)
    return n_pad, tm, tk


# --------------------------- kernel 1: XW1 = X @ W1 ---------------------------

def _xw_kernel(x_ref, w_ref, out_ref):
    out_ref[...] = jnp.dot(
        x_ref[...], w_ref[...], preferred_element_type=jnp.float32
    ).astype(out_ref.dtype)


def xw_forward(x, w1, *, tm):
    n_pad, f_in = x.shape
    h_pad = w1.shape[1]
    nr = n_pad // tm
    cost = pl.CostEstimate(
        flops=2 * n_pad * f_in * h_pad,
        transcendentals=0,
        bytes_accessed=x.size * 2 + nr * w1.size * 2 + n_pad * h_pad * 2,
    )
    return pl.pallas_call(
        _xw_kernel,
        out_shape=jax.ShapeDtypeStruct((n_pad, h_pad), jnp.bfloat16),
        grid_spec=pltpu.PrefetchScalarGridSpec(
            num_scalar_prefetch=0,
            grid=(nr,),
            in_specs=[
                pl.BlockSpec((tm, f_in), lambda i: (i, 0)),
                pl.BlockSpec((f_in, h_pad), lambda i: (0, 0)),
            ],
            out_specs=pl.BlockSpec((tm, h_pad), lambda i: (i, 0)),
        ),
        compiler_params=pltpu.CompilerParams(
            dimension_semantics=("parallel",),
            vmem_limit_bytes=VMEM_LIMIT,
        ),
        cost_estimate=cost,
    )(x, w1)


# --------- kernel 2: HW2 = (dropout(relu(A @ XW1 + b1))) @ W2 -----------------

def _layer1_kernel(a_ref, xw_ref, b1_ref, mask_ref, w2_ref, hw2_ref, acc_ref):
    k = pl.program_id(1)

    @pl.when(k == 0)
    def _():
        acc_ref[...] = jnp.zeros_like(acc_ref)

    acc_ref[...] += jnp.dot(a_ref[...], xw_ref[...],
                            preferred_element_type=jnp.float32)

    @pl.when(k == pl.num_programs(1) - 1)
    def _():
        h = jnp.maximum(acc_ref[...] + b1_ref[...], 0.0)
        # mask holds the pre-scaled keep mask {0.0, 2.0} in bf16 -> one VPU mul.
        h = h * mask_ref[...].astype(jnp.float32)
        hw2_ref[...] = jnp.dot(
            h.astype(jnp.bfloat16), w2_ref[...],
            preferred_element_type=jnp.float32,
        ).astype(hw2_ref.dtype)


def layer1_forward(a_hat, xw1, b1, mask, w2, *, tm, tk):
    n_pad = a_hat.shape[0]
    h_pad = xw1.shape[1]
    nr, nk = n_pad // tm, n_pad // tk
    cost = pl.CostEstimate(
        flops=2 * n_pad * n_pad * h_pad + 2 * n_pad * h_pad * C_PAD,
        transcendentals=0,
        bytes_accessed=(a_hat.size * 2 + nr * xw1.size * 2 + mask.size * 2
                        + w2.size * 2 + b1.size * 4 + n_pad * C_PAD * 2),
    )
    return pl.pallas_call(
        _layer1_kernel,
        out_shape=jax.ShapeDtypeStruct((n_pad, C_PAD), jnp.bfloat16),
        grid_spec=pltpu.PrefetchScalarGridSpec(
            num_scalar_prefetch=0,
            grid=(nr, nk),
            in_specs=[
                pl.BlockSpec((tm, tk), lambda i, k: (i, k)),        # A_hat tile
                pl.BlockSpec((tk, h_pad), lambda i, k: (k, 0)),     # XW1 tile
                pl.BlockSpec((1, h_pad), lambda i, k: (0, 0)),      # b1
                pl.BlockSpec((tm, h_pad), lambda i, k: (i, 0)),     # keep mask
                pl.BlockSpec((h_pad, C_PAD), lambda i, k: (0, 0)),  # W2
            ],
            out_specs=pl.BlockSpec((tm, C_PAD), lambda i, k: (i, 0)),
            scratch_shapes=[pltpu.VMEM((tm, h_pad), jnp.float32)],
        ),
        compiler_params=pltpu.CompilerParams(
            dimension_semantics=("parallel", "arbitrary"),
            vmem_limit_bytes=VMEM_LIMIT,
        ),
        cost_estimate=cost,
    )(a_hat, xw1, b1, mask, w2)


# -------- kernel 3: Z = A @ HW2 + b2 ; [logits | log_softmax] slab ------------

def _layer2_kernel(a_ref, hw2_ref, b2_ref, out_ref, acc_ref, *, num_class):
    k = pl.program_id(1)

    @pl.when(k == 0)
    def _():
        acc_ref[...] = jnp.zeros_like(acc_ref)

    acc_ref[...] += jnp.dot(a_ref[...], hw2_ref[...],
                            preferred_element_type=jnp.float32)

    @pl.when(k == pl.num_programs(1) - 1)
    def _():
        z = acc_ref[...] + b2_ref[...]
        col = jax.lax.broadcasted_iota(jnp.int32, z.shape, 1)
        valid = col < num_class
        m = jnp.max(jnp.where(valid, z, -jnp.inf), axis=1, keepdims=True)
        e = jnp.where(valid, jnp.exp(z - m), 0.0)
        s = jnp.sum(e, axis=1, keepdims=True)
        lsm = (z - m) - jnp.log(s)
        # lane-dense f32 output slab: [logits | log_softmax]
        out_ref[:, 0 * C_PAD:1 * C_PAD] = z
        out_ref[:, 1 * C_PAD:2 * C_PAD] = jnp.where(valid, lsm, 0.0)


def layer2_forward(a_hat, hw2, b2, num_class, *, tm, tk):
    n_pad = a_hat.shape[0]
    nr, nk = n_pad // tm, n_pad // tk
    kernel = functools.partial(_layer2_kernel, num_class=num_class)
    cost = pl.CostEstimate(
        flops=2 * n_pad * n_pad * C_PAD,
        transcendentals=n_pad * C_PAD,
        bytes_accessed=(a_hat.size * 2 + nr * hw2.size * 2 + b2.size * 4
                        + n_pad * 2 * C_PAD * 4),
    )
    return pl.pallas_call(
        kernel,
        out_shape=jax.ShapeDtypeStruct((n_pad, 2 * C_PAD), jnp.float32),
        grid_spec=pltpu.PrefetchScalarGridSpec(
            num_scalar_prefetch=0,
            grid=(nr, nk),
            in_specs=[
                pl.BlockSpec((tm, tk), lambda i, k: (i, k)),       # A_hat tile
                pl.BlockSpec((tk, C_PAD), lambda i, k: (k, 0)),    # HW2 tile
                pl.BlockSpec((1, C_PAD), lambda i, k: (0, 0)),     # b2
            ],
            out_specs=pl.BlockSpec((tm, 2 * C_PAD), lambda i, k: (i, 0)),
            scratch_shapes=[pltpu.VMEM((tm, C_PAD), jnp.float32)],
        ),
        compiler_params=pltpu.CompilerParams(
            dimension_semantics=("parallel", "arbitrary"),
            vmem_limit_bytes=VMEM_LIMIT,
        ),
        cost_estimate=cost,
    )(a_hat, hw2, b2)


# ------------------------------ JAX glue -------------------------------------

def gcn_normalize(edge_index, edge_weight, num_nodes, n_pad):
    """PyG gcn_norm: add self-loops (weight 1), symmetric normalization,
    densified to A_hat[dst, src] at padded size (padding stays zero)."""
    row, col = edge_index[0], edge_index[1]
    loop = jnp.arange(num_nodes, dtype=edge_index.dtype)
    row = jnp.concatenate([row, loop])
    col = jnp.concatenate([col, loop])
    w = jnp.concatenate(
        [edge_weight.astype(jnp.float32), jnp.ones((num_nodes,), jnp.float32)]
    )
    deg = jnp.zeros((num_nodes,), jnp.float32).at[col].add(w)
    deg_inv_sqrt = jnp.where(deg > 0, jax.lax.rsqrt(deg), 0.0)
    norm = deg_inv_sqrt[row] * w * deg_inv_sqrt[col]
    a_hat = jnp.zeros((n_pad, n_pad), jnp.float32).at[col, row].add(norm)
    return a_hat


def glorot(key, fan_in, fan_out):
    limit = (6.0 / (fan_in + fan_out)) ** 0.5
    return jax.random.uniform(
        key, (fan_in, fan_out), jnp.float32, minval=-limit, maxval=limit
    )


def init_params(key, num_node_features, hidden, num_class):
    k1, k2 = jax.random.split(key)
    return {
        "w1": glorot(k1, num_node_features, hidden),
        "b1": jnp.zeros((1, hidden), jnp.float32),
        "w2": glorot(k2, hidden, num_class),
        "b2": jnp.zeros((1, num_class), jnp.float32),
    }


def net_forward(x, edge_index, e_w, params, idx, dropout_key, num_class):
    """Mirrors Net.forward for the idx != 0 branch (idx = 100 in the script)."""
    del idx  # only the idx != 0 branch is implemented
    # TODO(synk): the idx == 0 branch additionally computes a cosine-similarity
    # over an (empty) module-level `edge_weights` tensor; its results are never
    # returned, so it is not implemented.

    n = x.shape[0]
    hidden = params["w1"].shape[1]
    assert num_class <= C_PAD
    n_pad, tm, tk = _choose_tiles(n)
    h_pad = _round_up(hidden, 128)

    # TODO(synk): for genuinely sparse graphs at large N, replace the dense
    # A_hat SpMM with a CSR gather kernel (PrefetchScalarGridSpec row pointers)
    # so traffic scales with nnz instead of N^2.
    # A_hat kept in bf16 to halve HBM traffic of the O(N^2) adjacency; use f32
    # here if tighter parity with the f32 PyTorch reference is required.
    a_hat = gcn_normalize(edge_index, e_w, n, n_pad).astype(jnp.bfloat16)

    x_p = jnp.pad(x, ((0, n_pad - n), (0, 0))).astype(jnp.bfloat16)
    w1_p = jnp.pad(params["w1"], ((0, 0), (0, h_pad - hidden))).astype(jnp.bfloat16)
    b1_p = jnp.pad(params["b1"], ((0, 0), (0, h_pad - hidden)))
    w2_p = jnp.pad(params["w2"],
                   ((0, h_pad - hidden), (0, C_PAD - num_class))).astype(jnp.bfloat16)
    b2_p = jnp.pad(params["b2"], ((0, 0), (0, C_PAD - num_class)))

    # F.dropout defaults: p = 0.5, training = True.  Keep mask pre-scaled by
    # 1/(1-p) = 2.0, stored in bf16 (exactly representable) to halve its HBM
    # read.  (Uses JAX's RNG stream, not torch's.)
    keep_mask = (
        jax.random.bernoulli(dropout_key, 0.5, (n_pad, h_pad))
        .astype(jnp.bfloat16) * 2.0
    )

    xw1 = xw_forward(x_p, w1_p, tm=tm)
    hw2 = layer1_forward(a_hat, xw1, b1_p, keep_mask, w2_p, tm=tm, tk=tk)
    out = layer2_forward(a_hat, hw2, b2_p, num_class, tm=tm, tk=tk)

    logits = out[:n, 0 * C_PAD:0 * C_PAD + num_class]
    log_probs = out[:n, 1 * C_PAD:1 * C_PAD + num_class]
    probs = jnp.exp(log_probs)   # softmax recomputed on the tiny sliced array
    err = 0
    return log_probs, logits, err, probs


# ------------------------------ main ------------------------------------------

if __name__ == "__main__":
    N = 16                # number of nodes
    F_IN = 8              # dataset.num_node_features
    HIDDEN = 64           # as in the module
    NUM_CLASS = 4         # dataset.num_classes
    IDX = 100             # as in the reference script

    key = jax.random.PRNGKey(0)
    k_x, k_w, k_ew, k_drop = jax.random.split(key, 4)

    # Node features.
    x = jax.random.normal(k_x, (N, F_IN), jnp.float32)

    # Simple bidirectional ring graph: edge_index shape (2, 2N).
    src = jnp.arange(N, dtype=jnp.int32)
    dst = (src + 1) % N
    edge_index = jnp.stack(
        [jnp.concatenate([src, dst]), jnp.concatenate([dst, src])], axis=0
    )

    # Edge weights e_w, one per edge.
    e_w = jax.random.uniform(k_ew, (edge_index.shape[1],), jnp.float32)

    params = init_params(k_w, F_IN, HIDDEN, NUM_CLASS)

    log_probs, x_out, err, probs = net_forward(
        x, edge_index, e_w, params, IDX, k_drop, NUM_CLASS
    )
    jax.block_until_ready((log_probs, x_out, probs))

    assert log_probs.shape == (N, NUM_CLASS)
    assert x_out.shape == (N, NUM_CLASS)
    assert probs.shape == (N, NUM_CLASS)
    assert err == 0
    # softmax rows sum to 1 and exp(log_softmax) == softmax (f32 tolerance).
    assert bool(jnp.allclose(probs.sum(axis=1), 1.0, atol=1e-3))
    assert bool(jnp.allclose(jnp.exp(log_probs), probs, atol=1e-3))
    assert bool(jnp.all(jnp.isfinite(log_probs)))
    print("KERNEL_OK")
</pallas_src>

<mosaic_0001>
module attributes {stable_mosaic.version = 11 : i64} {
  func.func @_xw_kernel(%arg0: i32, %arg1: memref<128x8xbf16, #tpu.memory_space<vmem>>, %arg2: memref<8x128xbf16, #tpu.memory_space<vmem>>, %arg3: memref<128x128xbf16, #tpu.memory_space<vmem>>) attributes {dimension_semantics = [#tpu.dimension_semantics<parallel>], iteration_bounds = array<i64: 1>, scalar_prefetch = 0 : i64, scratch_operands = 0 : i64, tpu.core_type = #tpu.core_type<tc>, window_params = [{transform_indices = @transform_0, window_bounds = array<i64: 128, 8>}, {pipeline_mode = #tpu.pipeline_mode<synchronous>, transform_indices = @transform_1, window_bounds = array<i64: 8, 128>}, {transform_indices = @transform_2, window_bounds = array<i64: 128, 128>}]} {
    %c0 = arith.constant 0 : index
    %c0_0 = arith.constant 0 : index
    %0 = vector.load %arg1[%c0, %c0_0] : memref<128x8xbf16, #tpu.memory_space<vmem>>, vector<128x8xbf16>
    %c0_1 = arith.constant 0 : index
    %c0_2 = arith.constant 0 : index
    %1 = vector.load %arg2[%c0_1, %c0_2] : memref<8x128xbf16, #tpu.memory_space<vmem>>, vector<8x128xbf16>
    %cst = arith.constant dense<0.000000e+00> : vector<128x128xf32>
    %2 = tpu.matmul %0, %1, %cst {dimension_numbers = #tpu.dot_dimension_numbers<[1], [0], [0], [1], [0, 0, 1, 1], [], []>} : vector<128x8xbf16>, vector<8x128xbf16>, vector<128x128xf32> -> vector<128x128xf32>
    %3 = arith.truncf %2 : vector<128x128xf32> to vector<128x128xbf16>
    %c0_3 = arith.constant 0 : index
    %c0_4 = arith.constant 0 : index
    %4 = vector.load %arg3[%c0_3, %c0_4] : memref<128x128xbf16, #tpu.memory_space<vmem>>, vector<128x128xbf16>
    tpu.vector_store %arg3[%c0_3, %c0_4], %3 {strides = array<i32>} : memref<128x128xbf16, #tpu.memory_space<vmem>>, vector<128x128xbf16>,
    return
  }
  func.func @transform_0(%arg0: i32) -> (i32, i32) {
    %c0_i32 = arith.constant 0 : i32
    %c0_i32_0 = arith.constant 0 : i32
    return %arg0, %c0_i32 : i32, i32
  }
  func.func @transform_1(%arg0: i32) -> (i32, i32) {
    %c0_i32 = arith.constant 0 : i32
    %c0_i32_0 = arith.constant 0 : i32
    %c0_i32_1 = arith.constant 0 : i32
    return %c0_i32, %c0_i32_0 : i32, i32
  }
  func.func @transform_2(%arg0: i32) -> (i32, i32) {
    %c0_i32 = arith.constant 0 : i32
    %c0_i32_0 = arith.constant 0 : i32
    return %arg0, %c0_i32 : i32, i32
  }
}

</mosaic_0001>

<bundles_post_ra>
// kernel: tpu_custom_call.1
= control target key start
LH: loop header
LB: loop body
LE: loop exit
PB: predicated region body
PF: predicated region fallthrough
CT: control target
= control target key end

     0   :  { %vm95_vm0 = vcmask 1043456   ;;  %vm70_vm1 = vcmask 64512   ;;  %s507_s0 = inlined_call_operand.vmem [shape: bf16[128,8], index: 0, kind: input, shape index: {}]   ;;  %s508_s1 = inlined_call_operand.vmem [shape: bf16[8,128], index: 1, kind: input, shape index: {}]   ;;  %s509_s2 = inlined_call_operand.hbm [shape: bf16[128,128], index: 2, kind: output, shape index: {}]  }
   0x1   :  { %v29_v0 = vld [vmem:[%s508_s1] sm:$0xf]  ;;  %v423_v4 = vld [vmem:[%s507_s0 + $0x8] sm:$0xff]   ;;  %v425_v6 = vld [vmem:[%s507_s0 + $0x10] sm:$0xff]  }
   0x2   :  { %v421_v1 = vld [vmem:[%s507_s0] sm:$0xff]   ;;  %416 = vmatprep.subr.msk.bf16.mxu0 %vm95_vm0, %v29_v0  ;;  %417 = vmatprep.subr.msk.bf16.mxu1 %vm95_vm0, %v29_v0  ;;  %v97_v2 = vsel %vm95_vm0, %v29_v0, 0  ;;  %v424_v5 = vld [vmem:[%s507_s0 + $0x28] sm:$0xff]   ;;  %v426_v7 = vld [vmem:[%s507_s0 + $0x30] sm:$0xff]  }
   0x3   :  { %397 = vmatpush3.bf16.msra.mxu0 %v97_v2  ;;  %415 = vmatpush3.bf16.msra.mxu1 %v97_v2  ;;  %v422_v3 = vld [vmem:[%s507_s0 + $0x20] sm:$0xff]  }
   0x4   :  { %398 = vmatprep.mubr.msk.bf16.mxu0 %vm70_vm1, %v421_v1  ;;  %406 = vmatprep.mubr.msk.bf16.mxu1 %vm70_vm1, %v422_v3 }
   0x6   :  { %399 = vmatmul.mubr.msk.bf16.vlgmr.msra.gmra.mxu0 %vm70_vm1, %v423_v4  ;;  %407 = vmatmul.mubr.msk.bf16.vlgmr.msra.gmra.mxu1 %vm70_vm1, %v424_v5 }
   0x7   :  { %402 = vmatprep.mubr.msk.bf16.mxu0 %vm70_vm1, %v425_v6  ;;  %410 = vmatprep.mubr.msk.bf16.mxu1 %vm70_vm1, %v426_v7 }
   0x8   :  { %7 = vsyncpa [#allocation3], 0  ;;  %v427_v8 = vld [vmem:[%s507_s0 + $0x18] sm:$0xff]  }
   0x9   :  { %v428_v9 = vld [vmem:[%s507_s0 + $0x38] sm:$0xff]   ;;  %s451_s0 = smov [#allocation2]  }
   0xa   :  { %s281_s26 = sshll.u32 %s451_s0, 4  ;;  %s282_s26 = int_to_ptr.vmem [resolvable:$true] %s281_s26 }
   0xb   :  { %s429_s27 = scalar_lea.vmem %s282_s26, 1024  ;;  %p434_p1 = scmp.lt.s32.totalorder %s282_s26, %s282_s26 }
   0xc   :  { %p430_p0 = scmp.ne.s32.totalorder %s282_s26, %s429_s27  ;;  %p435_p2 = scmp.lt.s32.totalorder %s429_s27, %s429_s27 }
   0xe   :  { %403 = vmatmul.mubr.msk.bf16.gmra.mxu0 %vm70_vm1, %v427_v8  ;;  %411 = vmatmul.mubr.msk.bf16.gmra.mxu1 %vm70_vm1, %v428_v9  ;;  %p436_p3 = por %p435_p2, %p434_p1 }
  0x10   :  { %p437_p4 = pnand %p436_p3, %p430_p0 }
  0xc6   :  { %v400_v10 = vpop.f32.mrf.mxu0  ;;  %v408_v11 = vpop.f32.mrf.mxu1 }
  0xc8   :  { %v133_v12 = vpop.f32.mrf.mxu0  ;;  %v165_v13 = vpop.f32.mrf.mxu1 }
  0xca   :  { %v401_v14 = vpop.f32.mrf.mxu0  ;;  %v409_v16 = vpop.f32.mrf.mxu1 }
  0xcb   :  { %v348_v15 = vpack.c.bf16 %v401_v14, %v400_v10  ;;  %v368_v17 = vpack.c.bf16 %v409_v16, %v408_v11 }
  0xcc   :  { %v136_v18 = vpop.f32.mrf.mxu0  ;;  %v168_v20 = vpop.f32.mrf.mxu1 }
  0xcd   :  { %380 = vst [vmem:[#allocation2 + $0x8] sm:$0xff] %v348_v15   ;;  %v343_v19 = vpack.c.bf16 %v136_v18, %v133_v12  ;;  %384 = vst [vmem:[#allocation2 + $0x28] sm:$0xff] %v368_v17   ;;  %v363_v21 = vpack.c.bf16 %v168_v20, %v165_v13 }
  0xce   :  { %v404_v22 = vpop.f32.mrf.mxu0  ;;  %v412_v23 = vpop.f32.mrf.mxu1 }
  0xcf   :  { %344 = vst [vmem:[#allocation2] sm:$0xff] %v343_v19   ;;  %383 = vst [vmem:[#allocation2 + $0x20] sm:$0xff] %v363_v21  }
  0xd0   :  { %v149_v24 = vpop.f32.mrf.mxu0  ;;  %v181_v25 = vpop.f32.mrf.mxu1 }
  0xd2   :  { %v405_v26 = vpop.f32.mrf.mxu0  ;;  %v413_v28 = vpop.f32.mrf.mxu1 }
  0xd3   :  { %v358_v27 = vpack.c.bf16 %v405_v26, %v404_v22  ;;  %v378_v29 = vpack.c.bf16 %v413_v28, %v412_v23 }
  0xd4   :  { %v152_v30 = vpop.f32.mrf.mxu0  ;;  %v184_v32 = vpop.f32.mrf.mxu1 }
  0xd5   :  { %382 = vst [vmem:[#allocation2 + $0x18] sm:$0xff] %v358_v27   ;;  %v353_v31 = vpack.c.bf16 %v152_v30, %v149_v24  ;;  %386 = vst [vmem:[#allocation2 + $0x38] sm:$0xff] %v378_v29   ;;  %v373_v33 = vpack.c.bf16 %v184_v32, %v181_v25 }
  0xd7   :  { %381 = vst [vmem:[#allocation2 + $0x10] sm:$0xff] %v353_v31   ;;  %385 = vst [vmem:[#allocation2 + $0x30] sm:$0xff] %v373_v33  }
  0xd8   :  { %440 = shalt.err (!%p437_p4)
}
  0xd9   :  { %s452_s28 = smov 64   ;;  %s453_s29 = smov 4  }
  0xda   :  { %287 = dma.vmem_to_hbm [thread:$0]  %s282_s26, 1024, %s509_s2, [#allocation3], %s452_s28, %s452_s28, %s453_s29  }
  0xdb   :  { %449 = dma.done.wait [#allocation3], 1024  }
  0xdc   :  { %450 = vsyncadd [#allocation3], 4294966272 }
  0xdd   :  { %291 = vsyncpa [#allocation3], 1 }

</bundles_post_ra>
